<compile_context>
chip_gen: v6e
topology: v6e:2x2x1
jax: 0.10.0
libtpu: 0.0.40
codegen_flags: <defaults>
</compile_context>

<pallas_src>
import functools

import jax
import jax.numpy as jnp
from jax.experimental import pallas as pl
from jax.experimental.pallas import tpu as pltpu


_SMEM = pl.BlockSpec(memory_space=pltpu.MemorySpace.SMEM)
_MIB = 1024 * 1024

F_MAPS = 18
LRELU_SLOPE = 0.1


def _mosaic_params(sems, working_bytes):
    # vmem limit sized from the per-step working set (+ headroom); floored at 16 MiB,
    # capped at 32 MiB so it is safe on every generation (v5e/v6e/v7x).
    lim = int(max(16 * _MIB, min(32 * _MIB, working_bytes + 4 * _MIB)))
    return pltpu.CompilerParams(dimension_semantics=tuple(sems), vmem_limit_bytes=lim)


# ----------------------------------------------------------------------------- kernels

def _decode_kernel(sr_ref, si_ref, xr_ref, xi_ref, img_ref):
    # sum_c conj(smaps[c]) * coil_image[c], written directly in NCHW (2, rows, W) layout.
    sr, si = sr_ref[...], si_ref[...]
    xr, xi = xr_ref[...], xi_ref[...]
    img_ref[0] = jnp.sum(sr * xr + si * xi, axis=0)   # real part
    img_ref[1] = jnp.sum(sr * xi - si * xr, axis=0)   # imag part


def _encode_kernel(sr_ref, si_ref, img_ref, or_ref, oi_ref):
    # smaps[c] * image  (complex multiply, image broadcast over coils), NCHW image input.
    sr, si = sr_ref[...], si_ref[...]
    ir, ii = img_ref[0], img_ref[1]
    or_ref[...] = sr * ir - si * ii
    oi_ref[...] = sr * ii + si * ir


def _dc_kernel(lam_ref, m_ref, k0r_ref, k0i_ref, ksr_ref, ksi_ref, rr_ref, ri_ref,
               or_ref, oi_ref):
    # out = kspace + (-lam * mask * (kspace - k0)) - refinement   (re/im planes)
    lam = lam_ref[0]
    m = m_ref[...]
    ksr, ksi = ksr_ref[...], ksi_ref[...]
    or_ref[...] = ksr - lam * m * (ksr - k0r_ref[...]) - rr_ref[...]
    oi_ref[...] = ksi - lam * m * (ksi - k0i_ref[...]) - ri_ref[...]


def _sos_kernel(xr_ref, xi_ref, or_ref, oi_ref):
    # coil-wise sum of squares of the real-view components (matches torch.sum(im**2, dim=0))
    xr, xi = xr_ref[...], xi_ref[...]
    or_ref[...] = jnp.sum(xr * xr, axis=0)
    oi_ref[...] = jnp.sum(xi * xi, axis=0)


def _conv3x3_kernel(w_ref, b_ref, xp_ref, o_ref, *, cin, cout, rows, W, slope, group):
    """Direct 3x3 conv on one row block.

    xp_ref is the full input with a 1-row circular halo on top/bottom: (cin, H+2, W),
    resident in VMEM (constant block index).  Column taps use circular wrap along the
    128-lane axis via pltpu.roll (non-negative shifts only).  Output-channel accumulators
    are processed `group` at a time so live vregs stay bounded.
    """
    r0 = pl.multiple_of(pl.program_id(0) * rows, rows)
    for oc0 in range(0, cout, group):
        g = min(group, cout - oc0)
        acc = [jnp.full((rows, W), b_ref[oc0 + k], dtype=jnp.float32) for k in range(g)]
        for ic in range(cin):
            for dy in range(3):
                base = xp_ref[ic, pl.ds(r0 + dy, rows), :]
                for dx in range(3):
                    # circular wrap along lanes; shift is always non-negative
                    xs = base if dx == 1 else pltpu.roll(base, (1 - dx) % W, 1)
                    for k in range(g):
                        wv = w_ref[((oc0 + k) * cin + ic) * 9 + dy * 3 + dx]
                        acc[k] = acc[k] + wv * xs
        for k in range(g):
            a = acc[k]
            if slope is not None:             # LeakyReLU
                a = jnp.where(a >= 0.0, a, slope * a)
            o_ref[oc0 + k] = a


# ----------------------------------------------------------------------------- wrappers

def coil_reduce_to_image(smr, smi, xr, xi, *, rows=48):
    """E^H coil combine, fused with the permute to NCHW: -> (2, H, W)."""
    C, H, W = smr.shape
    assert H % rows == 0
    nb = H // rows
    blk_c = pl.BlockSpec((C, rows, W), lambda i: (0, i, 0))
    blk_o = pl.BlockSpec((2, rows, W), lambda i: (0, i, 0))
    wb = (4 * C + 2) * rows * W * 4 * 2
    return pl.pallas_call(
        _decode_kernel,
        grid=(nb,),
        out_shape=jax.ShapeDtypeStruct((2, H, W), jnp.float32),
        in_specs=[blk_c, blk_c, blk_c, blk_c],
        out_specs=blk_o,
        compiler_params=_mosaic_params(("parallel",), wb),
    )(smr, smi, xr, xi)


def coil_expand_from_image(smr, smi, img, *, rows=48):
    """E coil expand from the NCHW (2, H, W) image: -> (C, H, W) re, im."""
    C, H, W = smr.shape
    assert H % rows == 0
    nb = H // rows
    blk_c = pl.BlockSpec((C, rows, W), lambda i: (0, i, 0))
    blk_2 = pl.BlockSpec((2, rows, W), lambda i: (0, i, 0))
    wb = (4 * C + 2) * rows * W * 4 * 2
    return pl.pallas_call(
        _encode_kernel,
        grid=(nb,),
        out_shape=(jax.ShapeDtypeStruct((C, H, W), jnp.float32),
                   jax.ShapeDtypeStruct((C, H, W), jnp.float32)),
        in_specs=[blk_c, blk_c, blk_2],
        out_specs=(blk_c, blk_c),
        compiler_params=_mosaic_params(("parallel",), wb),
    )(smr, smi, img)


def dc_update(lam, mask, k0r, k0i, ksr, ksi, rfr, rfi, *, rows=48):
    """kspace + (-lam*mask*(kspace-k0)) - refinement, computed on re/im planes."""
    C, H, W = ksr.shape
    assert H % rows == 0
    nb = H // rows
    blk_c = pl.BlockSpec((C, rows, W), lambda i: (0, i, 0))
    blk_m = pl.BlockSpec((rows, W), lambda i: (i, 0))
    wb = (8 * C + 1) * rows * W * 4 * 2
    return pl.pallas_call(
        _dc_kernel,
        grid=(nb,),
        out_shape=(jax.ShapeDtypeStruct((C, H, W), jnp.float32),
                   jax.ShapeDtypeStruct((C, H, W), jnp.float32)),
        in_specs=[_SMEM, blk_m, blk_c, blk_c, blk_c, blk_c, blk_c, blk_c],
        out_specs=(blk_c, blk_c),
        compiler_params=_mosaic_params(("parallel",), wb),
    )(lam, mask, k0r, k0i, ksr, ksi, rfr, rfi)


def sos_crop(imr, imi, *, rows=32):
    """Coil-wise sum of squares (re and im separately), with the final row crop fused."""
    C, H, W = imr.shape
    idxL = (H - W) // 2
    assert idxL % rows == 0 and W % rows == 0
    off = idxL // rows
    nb = W // rows
    blk_i = pl.BlockSpec((C, rows, W), lambda i: (0, i + off, 0))
    blk_o = pl.BlockSpec((rows, W), lambda i: (i, 0))
    wb = (2 * C + 2) * rows * W * 4 * 2
    return pl.pallas_call(
        _sos_kernel,
        grid=(nb,),
        out_shape=(jax.ShapeDtypeStruct((W, W), jnp.float32),
                   jax.ShapeDtypeStruct((W, W), jnp.float32)),
        in_specs=[blk_i, blk_i],
        out_specs=(blk_o, blk_o),
        compiler_params=_mosaic_params(("parallel",), wb),
    )(imr, imi)


def conv3x3(xp, w, b, *, slope, rows=32, group=3):
    """3x3 conv with circular boundary: xp is (cin, H+2, W) with a 1-row circular halo."""
    cout, cin = w.shape[0], w.shape[1]
    _, Hp2, W = xp.shape
    H = Hp2 - 2
    assert H % rows == 0
    nb = H // rows
    kern = functools.partial(_conv3x3_kernel, cin=cin, cout=cout, rows=rows, W=W,
                             slope=slope, group=group)
    wb = cin * Hp2 * W * 4 + 2 * cout * rows * W * 4
    return pl.pallas_call(
        kern,
        grid=(nb,),
        out_shape=jax.ShapeDtypeStruct((cout, H, W), jnp.float32),
        in_specs=[_SMEM, _SMEM,
                  pl.BlockSpec((cin, Hp2, W), lambda i: (0, 0, 0))],  # resident input
        out_specs=pl.BlockSpec((cout, rows, W), lambda i: (0, i, 0)),
        compiler_params=_mosaic_params(("parallel",), wb),
    )(w.reshape(-1).astype(jnp.float32), b.astype(jnp.float32), xp)


def regularizer_apply(img, params, *, rows=32):
    """conv3x3(2->f_maps) + LeakyReLU + conv3x3(f_maps->2) regularizer on the NCHW image.

    The reference circular-pads by >=32 pixels, runs the model and center-crops; for this
    2-conv stand-in (receptive field 2) that is mathematically identical to running with
    circular boundary conditions on the unpadded image, so the pad/crop round trip is
    replaced by a 1-row circular halo (rows) + in-kernel lane rolls (columns).
    """
    # TODO(synk): UNet2D(2, 2, depth=4, f_maps=18, layer_order='cli') source not provided;
    # this stand-in keeps the same NCHW interface.  The real depth-4 UNet would need the
    # explicit circular pad path (larger receptive field) and an im2col+MXU formulation.
    def circ_pad_rows(x):
        return jnp.concatenate([x[:, -1:, :], x, x[:, :1, :]], axis=1)

    h = conv3x3(circ_pad_rows(img), params["w1"], params["b1"],
                slope=LRELU_SLOPE, rows=rows, group=3)
    out = conv3x3(circ_pad_rows(h), params["w2"], params["b2"],
                  slope=None, rows=rows, group=2)
    return out


# ----------------------------------------------------------------------------- FFT helpers (plain JAX)
# TODO(synk): centered ortho FFT/IFFT (sigpy linop semantics) has no Pallas equivalent; kept in jnp.fft.

def centered_fftn(x, axes):
    x = jnp.fft.ifftshift(x, axes=axes)
    x = jnp.fft.fftn(x, axes=axes, norm="ortho")
    return jnp.fft.fftshift(x, axes=axes)


def centered_ifftn(x, axes):
    x = jnp.fft.ifftshift(x, axes=axes)
    x = jnp.fft.ifftn(x, axes=axes, norm="ortho")
    return jnp.fft.fftshift(x, axes=axes)


# ----------------------------------------------------------------------------- EEVarNet blocks / forward

def eevarnet_block(k0r, k0i, ksr, ksi, mask, smr, smi, params):
    # E^H : per-coil centered IFFT then coil combine (fused with the NCHW permute).
    coil = centered_ifftn(ksr + 1j * ksi, axes=(-2, -1))
    img = coil_reduce_to_image(smr, smi,
                               jnp.real(coil).astype(jnp.float32),
                               jnp.imag(coil).astype(jnp.float32))
    # regularizer (circular-boundary conv pair == reference pad(32)->model->crop)
    img = regularizer_apply(img, params)
    # E : coil expand then per-coil centered FFT.
    er, ei = coil_expand_from_image(smr, smi, img)
    k = centered_fftn(er + 1j * ei, axes=(-2, -1))
    rfr = jnp.real(k).astype(jnp.float32)
    rfi = jnp.imag(k).astype(jnp.float32)
    # data consistency.
    return dc_update(params["lam"], mask, k0r, k0i, ksr, ksi, rfr, rfi)


def eevarnet_forward(k0_ri, mask, smaps_ri, cascade_params):
    # split the PyTorch-style real views into lane-dense re/im planes once
    k0r, k0i = k0_ri[..., 0], k0_ri[..., 1]
    smr, smi = smaps_ri[..., 0], smaps_ri[..., 1]

    # kspace = k0.clone()
    ksr, ksi = k0r, k0i
    for params in cascade_params:
        ksr, ksi = eevarnet_block(k0r, k0i, ksr, ksi, mask, smr, smi, params)

    # final: sp.linop.IFFT(k0.shape[:-1], axes=range(-3, 0)) -> centered ortho IFFT over
    # (coil, row, col), then coil-wise sum of squares of the real view + center row crop.
    im = centered_ifftn(ksr + 1j * ksi, axes=(-3, -2, -1))
    sosr, sosi = sos_crop(jnp.real(im).astype(jnp.float32),
                          jnp.imag(im).astype(jnp.float32))
    return jnp.stack([sosr, sosi], axis=-1)


# ----------------------------------------------------------------------------- deterministic setup

def make_smaps(C, H, W):
    y = jnp.linspace(-1.0, 1.0, H)[:, None]
    x = jnp.linspace(-1.0, 1.0, W)[None, :]
    maps = []
    for c in range(C):
        ang = 2.0 * jnp.pi * c / C
        cy, cx = 0.6 * jnp.cos(ang), 0.6 * jnp.sin(ang)
        mag = jnp.exp(-((y - cy) ** 2 + (x - cx) ** 2) / 0.8)
        phase = 0.5 * (c + 1) * (y * x)
        maps.append(mag * jnp.exp(1j * phase))
    s = jnp.stack(maps)                                # (C, H, W) complex
    rss = jnp.sqrt(jnp.sum(jnp.abs(s) ** 2, axis=0, keepdims=True)) + 1e-6
    s = s / rss
    return jnp.stack([jnp.real(s), jnp.imag(s)], axis=-1).astype(jnp.float32)


def make_mask(key, H, W):
    m = (jax.random.uniform(key, (H, W)) < 0.35).astype(jnp.float32)
    m = m.at[:, W // 2 - 8: W // 2 + 8].set(1.0)       # fully sampled center
    return m


def init_params(key, num_cascades, f_maps=F_MAPS):
    params = []
    for c in range(num_cascades):
        k1, k2 = jax.random.split(jax.random.fold_in(key, 100 + c))
        params.append({
            "lam": jnp.ones((1,), jnp.float32),                                  # scale_init = 1.0
            "w1": 0.05 * jax.random.normal(k1, (f_maps, 2, 3, 3), jnp.float32),
            "b1": jnp.zeros((f_maps,), jnp.float32),
            "w2": 0.05 * jax.random.normal(k2, (2, f_maps, 3, 3), jnp.float32),
            "b2": jnp.zeros((2,), jnp.float32),
        })
    return params


def encode_image(img_ri, smr, smi, mask):
    """Synthetic k0 = mask * E(image), image given as (H, W, 2) real view."""
    img = jnp.stack([img_ri[..., 0], img_ri[..., 1]], axis=0)   # (2, H, W)
    er, ei = coil_expand_from_image(smr, smi, img)
    k = centered_fftn(er + 1j * ei, axes=(-2, -1))
    k_ri = jnp.stack([jnp.real(k), jnp.imag(k)], axis=-1).astype(jnp.float32)
    return k_ri * mask[None, :, :, None]


# ----------------------------------------------------------------------------- main

if __name__ == "__main__":
    key = jax.random.PRNGKey(0)
    C, H, W = 4, 192, 128        # coils, rows, cols (H > W so the final crop is exercised)
    num_cascades = 2             # small demo (module default is 12)

    smaps = make_smaps(C, H, W)
    mask = make_mask(jax.random.fold_in(key, 0), H, W)

    gt = 0.5 * jax.random.normal(jax.random.fold_in(key, 1), (H, W, 2), jnp.float32)
    k0 = encode_image(gt, smaps[..., 0], smaps[..., 1], mask)

    cascade_params = init_params(key, num_cascades)

    fwd = jax.jit(eevarnet_forward)
    out = jax.block_until_ready(fwd(k0, mask, smaps, cascade_params))

    assert out.shape == (W, W, 2), out.shape
    assert bool(jnp.all(jnp.isfinite(out)))
    print("KERNEL_OK")
</pallas_src>

<mosaic_0001>
module attributes {stable_mosaic.version = 11 : i64} {
  func.func @_encode_kernel(%arg0: i32, %arg1: memref<4x48x128xf32, #tpu.memory_space<vmem>>, %arg2: memref<4x48x128xf32, #tpu.memory_space<vmem>>, %arg3: memref<2x48x128xf32, #tpu.memory_space<vmem>>, %arg4: memref<4x48x128xf32, #tpu.memory_space<vmem>>, %arg5: memref<4x48x128xf32, #tpu.memory_space<vmem>>) attributes {dimension_semantics = [#tpu.dimension_semantics<parallel>], iteration_bounds = array<i64: 4>, scalar_prefetch = 0 : i64, scratch_operands = 0 : i64, tpu.core_type = #tpu.core_type<tc>, window_params = [{transform_indices = @transform_0, window_bounds = array<i64: 4, 48, 128>}, {transform_indices = @transform_1, window_bounds = array<i64: 4, 48, 128>}, {transform_indices = @transform_2, window_bounds = array<i64: 2, 48, 128>}, {transform_indices = @transform_3, window_bounds = array<i64: 4, 48, 128>}, {transform_indices = @transform_4, window_bounds = array<i64: 4, 48, 128>}]} {
    %c0 = arith.constant 0 : index
    %c0_0 = arith.constant 0 : index
    %c0_1 = arith.constant 0 : index
    %0 = vector.load %arg1[%c0, %c0_0, %c0_1] : memref<4x48x128xf32, #tpu.memory_space<vmem>>, vector<4x48x128xf32>
    %c0_2 = arith.constant 0 : index
    %c0_3 = arith.constant 0 : index
    %c0_4 = arith.constant 0 : index
    %1 = vector.load %arg2[%c0_2, %c0_3, %c0_4] : memref<4x48x128xf32, #tpu.memory_space<vmem>>, vector<4x48x128xf32>
    %c0_5 = arith.constant 0 : index
    %c0_6 = arith.constant 0 : index
    %c0_7 = arith.constant 0 : index
    %2 = vector.load %arg3[%c0_5, %c0_6, %c0_7] : memref<2x48x128xf32, #tpu.memory_space<vmem>>, vector<1x48x128xf32>
    %3 = vector.shape_cast %2 : vector<1x48x128xf32> to vector<48x128xf32>
    %c1 = arith.constant 1 : index
    %c0_8 = arith.constant 0 : index
    %c0_9 = arith.constant 0 : index
    %4 = vector.load %arg3[%c1, %c0_8, %c0_9] : memref<2x48x128xf32, #tpu.memory_space<vmem>>, vector<1x48x128xf32>
    %5 = vector.shape_cast %4 : vector<1x48x128xf32> to vector<48x128xf32>
    %6 = vector.shape_cast %3 : vector<48x128xf32> to vector<1x48x128xf32>
    %7 = vector.broadcast %6 : vector<1x48x128xf32> to vector<4x48x128xf32>
    %8 = arith.mulf %0, %7 : vector<4x48x128xf32>
    %9 = vector.shape_cast %5 : vector<48x128xf32> to vector<1x48x128xf32>
    %10 = vector.broadcast %9 : vector<1x48x128xf32> to vector<4x48x128xf32>
    %11 = arith.mulf %1, %10 : vector<4x48x128xf32>
    %12 = arith.subf %8, %11 : vector<4x48x128xf32>
    %c0_10 = arith.constant 0 : index
    %c0_11 = arith.constant 0 : index
    %c0_12 = arith.constant 0 : index
    %13 = vector.load %arg4[%c0_10, %c0_11, %c0_12] : memref<4x48x128xf32, #tpu.memory_space<vmem>>, vector<4x48x128xf32>
    tpu.vector_store %arg4[%c0_10, %c0_11, %c0_12], %12 {strides = array<i32>} : memref<4x48x128xf32, #tpu.memory_space<vmem>>, vector<4x48x128xf32>,
    %14 = vector.shape_cast %5 : vector<48x128xf32> to vector<1x48x128xf32>
    %15 = vector.broadcast %14 : vector<1x48x128xf32> to vector<4x48x128xf32>
    %16 = arith.mulf %0, %15 : vector<4x48x128xf32>
    %17 = vector.shape_cast %3 : vector<48x128xf32> to vector<1x48x128xf32>
    %18 = vector.broadcast %17 : vector<1x48x128xf32> to vector<4x48x128xf32>
    %19 = arith.mulf %1, %18 : vector<4x48x128xf32>
    %20 = arith.addf %16, %19 : vector<4x48x128xf32>
    %c0_13 = arith.constant 0 : index
    %c0_14 = arith.constant 0 : index
    %c0_15 = arith.constant 0 : index
    %21 = vector.load %arg5[%c0_13, %c0_14, %c0_15] : memref<4x48x128xf32, #tpu.memory_space<vmem>>, vector<4x48x128xf32>
    tpu.vector_store %arg5[%c0_13, %c0_14, %c0_15], %20 {strides = array<i32>} : memref<4x48x128xf32, #tpu.memory_space<vmem>>, vector<4x48x128xf32>,
    return
  }
  func.func @transform_0(%arg0: i32) -> (i32, i32, i32) {
    %c0_i32 = arith.constant 0 : i32
    %c0_i32_0 = arith.constant 0 : i32
    %c0_i32_1 = arith.constant 0 : i32
    return %c0_i32, %arg0, %c0_i32_0 : i32, i32, i32
  }
  func.func @transform_1(%arg0: i32) -> (i32, i32, i32) {
    %c0_i32 = arith.constant 0 : i32
    %c0_i32_0 = arith.constant 0 : i32
    %c0_i32_1 = arith.constant 0 : i32
    return %c0_i32, %arg0, %c0_i32_0 : i32, i32, i32
  }
  func.func @transform_2(%arg0: i32) -> (i32, i32, i32) {
    %c0_i32 = arith.constant 0 : i32
    %c0_i32_0 = arith.constant 0 : i32
    %c0_i32_1 = arith.constant 0 : i32
    return %c0_i32, %arg0, %c0_i32_0 : i32, i32, i32
  }
  func.func @transform_3(%arg0: i32) -> (i32, i32, i32) {
    %c0_i32 = arith.constant 0 : i32
    %c0_i32_0 = arith.constant 0 : i32
    %c0_i32_1 = arith.constant 0 : i32
    return %c0_i32, %arg0, %c0_i32_0 : i32, i32, i32
  }
  func.func @transform_4(%arg0: i32) -> (i32, i32, i32) {
    %c0_i32 = arith.constant 0 : i32
    %c0_i32_0 = arith.constant 0 : i32
    %c0_i32_1 = arith.constant 0 : i32
    return %c0_i32, %arg0, %c0_i32_0 : i32, i32, i32
  }
}

</mosaic_0001>

<bundles_post_ra>
// kernel: tpu_custom_call.1
= control target key start
LH: loop header
LB: loop body
LE: loop exit
PB: predicated region body
PF: predicated region fallthrough
CT: control target
= control target key end

     0   :  { %s1730_s0 = inlined_call_operand.hbm [shape: f32[4,192,128], index: 0, kind: input, shape index: {}]   ;;  %s1731_s1 = inlined_call_operand.hbm [shape: f32[4,192,128], index: 1, kind: input, shape index: {}]   ;;  %s1732_s2 = inlined_call_operand.hbm [shape: f32[2,192,128], index: 2, kind: input, shape index: {}]   ;;  %s1733_s3 = inlined_call_operand.hbm [shape: f32[4,192,128], index: 3, kind: output, shape index: {0}]   ;;  %s1734_s4 = inlined_call_operand.hbm [shape: f32[4,192,128], index: 4, kind: output, shape index: {1}]  }
   0x1   :  { %1741 = sst [smem:[#allocation34_spill]] %s1730_s0 }
   0x2   :  { %10 = vsyncpa [#allocation3], 0 }
   0x3   :  { %12 = vsyncpa [#allocation3 + $0x1], 0 }
   0x4   :  { %13 = vsyncpa [#allocation6], 0 }
   0x5   :  { %15 = vsyncpa [#allocation6 + $0x1], 0 }
   0x6   :  { %16 = vsyncpa [#allocation4], 0 }
   0x7   :  { %18 = vsyncpa [#allocation4 + $0x1], 0 }
   0x8   :  { %19 = vsyncpa [#allocation10], 0 }
   0x9   :  { %21 = vsyncpa [#allocation10 + $0x1], 0  ;;  %s1119_s15 = smov 0   ;;  %s1121_s16 = smov 0  }
   0xa   :  { %s1123_s17 = smov 0   ;;  %s1125_s18 = smov 0  }
   0xb LB: > { %s1140_s19 = sadd.s32 4294967295, %s1060_s18   ;;  %s866_s20 = sadd.s32 4294967294, %s1060_s18   ;;  %s1060_s18 = sphi %s1125_s18, %s1762_s18   ;;  %s1056_s17 = sphi %s1123_s17, %s1761_s17   ;;  %s1052_s16 = sphi %s1121_s16, %s1760_s16   ;;  %s1048_s15 = sphi %s1119_s15, %s1759_s15  }
   0xc   : > { %s1144_s21 = sadd.s32 1, %s1060_s18   ;;  %s34_s22 = sadd.s32 1, %s1056_s17 }
   0xd   : > { %s31_s23 = ssub.s32 %s1060_s18, %s1144_s21  ;;  %p41_p0 = scmp.ne.s32.totalorder %s1056_s17, %s1052_s16 }
   0xe   : > { %p32_p1 = scmp.eq.s32.totalorder %s31_s23, 0  ;;  %p42_p2 = scmp.eq.s32.totalorder %s1060_s18, 0 }
   0xf   : > { %p47_p3 = scmp.ne.s32.totalorder %s1052_s16, %s1048_s15  ;;  %p48_p4 = scmp.eq.s32.totalorder %s1140_s19, 0 }
  0x10   : > { %s1156_s24 = scalar_select %p32_p1, %s1056_s17, %s34_s22  }
  0x11   : > { %p1158_p5 = por %p42_p2, %p41_p0  ;;  %p1162_p6 = por %p48_p4, %p47_p3 }
  0x12   : > { %p123_p7 = scmp.eq.s32.totalorder %s1140_s19, 3  ;;  %p129_p8 = scmp.eq.s32.totalorder %s866_s20, 3 }
  0x13   : > { %p868_p11 = scmp.ge.s32.totalorder %s1060_s18, 4 }
  0x14   : > { %p1167_p9 = por %p123_p7, %p41_p0  ;;  %p1171_p10 = por %p129_p8, %p47_p3 }
  0x15   : > { %171 = sbr.rel (%p868_p11) target bundleno = 64 (0x40), region = 16 }
  0x1a   : > { %s1177_s29 = sand.u32 1, %s1056_s17   ;;  %s1180_s30 = smul.u32 768, %s1060_s18 }
  0x1b   : > { %s894_s5 = smul.u32 192, %s1177_s29  ;;  %s1062_s6 = smov 3072  }
  0x1c   : > { %900 = sst [smem:[#allocation12]] (%p1158_p5), %s1062_s6  ;;  %s1063_s14 = smov 768  }
  0x1d   : > { %s899_s7 = scalar_select %p1158_p5, [#allocation0], [#allocation21] }
  0x1e   : > { %s1746_s0 = sld [smem:[#allocation34_spill]]  ;;  %s179_s12 = scalar_lea.vmem [#allocation2], %s894_s5 }
  0x1f   : > { %s190_s11 = sld [smem:[%s899_s7]]   ;;  %s198_s13 = sshll.u32 %s179_s12, 4  ;;  %s199_s13 = int_to_ptr.vmem [resolvable:$true] %s198_s13 }
  0x20   : > { %901 = sst [smem:[#allocation12 + $0x1]] (%p1158_p5), %s1063_s14  ;;  %s1064_s20 = smov 6  }
  0x21   : > { %902 = sst [smem:[#allocation12 + $0x2]] (%p1158_p5), %s1064_s20  ;;  %s1065_s22 = smov 128  }
  0x22   : > { %903 = sst [smem:[#allocation12 + $0x3]] (%p1158_p5), %s1065_s22  ;;  %s1066_s23 = smov 8  }
  0x23   : > { %904 = sst [smem:[#allocation12 + $0x4]] (%p1158_p5), %s1065_s22  ;;  %s176_s8 = scalar_lea.sflag [#allocation3], %s1177_s29 }
  0x24   : > { %s185_s10 = scalar_lea.hbm %s1746_s0, %s1180_s30  ;;  %905 = sst [smem:[#allocation12 + $0x5]] (%p1158_p5), %s1066_s23 }
  0x25   : > { %s870_s6 = sshll.u32 %s190_s11, 26  ;;  %s1067_s9 = smov 131072  }
  0x26   : > { %s871_s7 = sadd.s32 134217728, %s870_s6 }
  0x27   : > { %906 = dma.general (%p1158_p5), %s185_s10, 3072, %s199_s13, %s176_s8, %s1067_s9, [#allocation12], %s871_s7, 0  }
  0x28   : > { %s221_s12 = sand.u32 1, %s1060_s18   ;;  %s231_s22 = scalar_lea.hbm %s1731_s1, %s1180_s30 }
  0x29   : > { %s907_s11 = scalar_select %p1158_p5, [#allocation0], [#allocation22] }
  0x2a   : > { %s225_s23 = scalar_lea.vmem [#allocation5], %s894_s5  ;;  %s1068_s10 = smov 3072  }
  0x2b   : > { %s244_s6 = sshll.u32 %s225_s23, 4  ;;  %s236_s0 = sld [smem:[%s907_s11]]   ;;  %s245_s6 = int_to_ptr.vmem [resolvable:$true] %s244_s6 }
  0x2c   : > { %908 = sst [smem:[#allocation14]] (%p1158_p5), %s1068_s10  ;;  %s1069_s13 = smov 768  }
  0x2d   : > { %909 = sst [smem:[#allocation14 + $0x1]] (%p1158_p5), %s1069_s13  ;;  %s1070_s7 = smov 6  }
  0x2e   : > { %910 = sst [smem:[#allocation14 + $0x2]] (%p1158_p5), %s1070_s7  ;;  %s1071_s8 = smov 128  }
  0x2f   : > { %911 = sst [smem:[#allocation14 + $0x3]] (%p1158_p5), %s1071_s8  ;;  %s1072_s5 = smov 8  }
  0x30   : > { %912 = sst [smem:[#allocation14 + $0x4]] (%p1158_p5), %s1071_s8  ;;  %s222_s20 = scalar_lea.sflag [#allocation6], %s221_s12 }
  0x31   : > { %s873_s9 = sshll.u32 %s236_s0, 26  ;;  %913 = sst [smem:[#allocation14 + $0x5]] (%p1158_p5), %s1072_s5 }
  0x32   : > { %s874_s14 = sadd.s32 134217728, %s873_s9  ;;  %s1073_s11 = smov 131072  }
  0x33   : > { %914 = dma.general (%p1158_p5), %s231_s22, 3072, %s245_s6, %s222_s20, %s1073_s11, [#allocation14], %s874_s14, 0  }
  0x34   : > { %s896_s23 = smul.u32 96, %s1177_s29  ;;  %s277_s0 = scalar_lea.hbm %s1732_s2, %s1180_s30 }
  0x35   : > { %s915_s7 = scalar_select %p1158_p5, [#allocation0], [#allocation23] }
  0x36   : > { %s271_s12 = scalar_lea.vmem [#allocation7], %s896_s23  ;;  %s1074_s22 = smov 3072  }
  0x37   : > { %s282_s8 = sld [smem:[%s915_s7]]   ;;  %s290_s9 = sshll.u32 %s271_s12, 4  ;;  %s291_s9 = int_to_ptr.vmem [resolvable:$true] %s290_s9 }
  0x38   : > { %916 = sst [smem:[#allocation16]] (%p1158_p5), %s1074_s22  ;;  %s1075_s6 = smov 768  }
  0x39   : > { %917 = sst [smem:[#allocation16 + $0x1]] (%p1158_p5), %s1075_s6  ;;  %s1076_s29 = smov 6  }
  0x3a   : > { %918 = sst [smem:[#allocation16 + $0x2]] (%p1158_p5), %s1076_s29  ;;  %s1077_s5 = smov 128  }
  0x3b   : > { %919 = sst [smem:[#allocation16 + $0x3]] (%p1158_p5), %s1077_s5  ;;  %s1078_s11 = smov 8  }
  0x3c   : > { %920 = sst [smem:[#allocation16 + $0x4]] (%p1158_p5), %s1077_s5  ;;  %s1079_s23 = smov 131072  }
  0x3d   : > { %s876_s30 = sshll.u32 %s282_s8, 26  ;;  %921 = sst [smem:[#allocation16 + $0x5]] (%p1158_p5), %s1078_s11 }
  0x3e   : > { %s877_s14 = sadd.s32 134217728, %s876_s30 }
  0x3f   : > { %922 = dma.general (%p1158_p5), %s277_s0, 1536, %s291_s9, %s222_s20, %s1079_s23, [#allocation16], %s877_s14, 0  }
  0x40 PF: > { %p878_p12 = scmp.ge.s32.totalorder %s1060_s18, 1  ;;  %p311_p13 = scmp.lt.s32.totalorder %s1060_s18, 5 }
  0x42   : > { %p312_p0 = pnand %p878_p12, %p311_p13 }
  0x44   : > { %315 = sbr.rel (%p312_p0) target bundleno = 147 (0x93), region = 32 }
  0x49   : > { %s1249_s10 = sand.u32 1, %s1052_s16  }
  0x4a   : > { %s1252_s13 = smul.u32 192, %s1249_s10  ;;  %s318_s7 = scalar_lea.sflag [#allocation3], %s1249_s10 }
  0x4c   : > { %s1256_s8 = scalar_lea.vmem [#allocation2], %s1252_s13 }
  0x4d   : > { %1031 = dma.done.wait (%p1162_p6), %s318_s7, 3072  }
  0x4e   : > { %1033 = vsyncadd (%p1162_p6), %s318_s7, 4294964224  ;;  %s326_s25 = sand.u32 1, %s1140_s19   ;;  %s1264_s0 = scalar_lea.vmem [#allocation5], %s1252_s13 }
  0x4f   : > { %s327_s20 = scalar_lea.sflag [#allocation6], %s326_s25 }
  0x50   : > { %1035 = dma.done.wait (%p1162_p6), %s327_s20, 4608  }
  0x51   : > { %1037 = vsyncadd (%p1162_p6), %s327_s20, 4294962688  ;;  %s898_s12 = smul.u32 96, %s1249_s10  ;;  %v384_v0 = vld [vmem:[%s1256_s8] sm:$0xff]  ;;  %v385_v5 = vld [vmem:[%s1256_s8 + $0x8] sm:$0xff]  ;;  %s1322_s26 = scalar_lea.vmem [#allocation8], %s1252_s13 }
  0x52   : > { %v408_v1 = vld [vmem:[%s1264_s0] sm:$0xff]  ;;  %v409_v6 = vld [vmem:[%s1264_s0 + $0x8] sm:$0xff]  ;;  %v386_v11 = vld [vmem:[%s1256_s8 + $0x10] sm:$0xff]  ;;  %s1336_s22 = scalar_lea.vmem [#allocation9], %s1252_s13  ;;  %s638_s6 = scalar_lea.sflag [#allocation4], %s1249_s10 }
  0x53   : > { %s1273_s9 = scalar_lea.vmem [#allocation7], %s898_s12  ;;  %v410_v15 = vld [vmem:[%s1264_s0 + $0x10] sm:$0xff]  ;;  %v387_v23 = vld [vmem:[%s1256_s8 + $0x18] sm:$0xff]  ;;  %v388_v30 = vld [vmem:[%s1256_s8 + $0x20] sm:$0xff]  ;;  %s643_s29 = scalar_lea.sflag [#allocation10], %s1249_s10 }
  0x54   : > { %v1276_v2 = vld [vmem:[%s1273_s9] sm:$0xff]  ;;  %v1279_v3 = vld [vmem:[%s1273_s9 + $0x30] sm:$0xff]  ;;  %v1287_v9 = vld [vmem:[%s1273_s9 + $0x8] sm:$0xff] }
  0x55   : > { %v445_v4 = vmul.f32 %v1276_v2, %v384_v0  ;;  %v565_v7 = vmul.f32 %v1276_v2, %v408_v1  ;;  %v469_v8 = vmul.f32 %v1279_v3, %v408_v1  ;;  %v1290_v10 = vld [vmem:[%s1273_s9 + $0x38] sm:$0xff]  ;;  %v541_v12 = vmul.f32 %v1279_v3, %v384_v0  ;;  %v1298_v16 = vld [vmem:[%s1273_s9 + $0x10] sm:$0xff]  ;;  %v1301_v17 = vld [vmem:[%s1273_s9 + $0x40] sm:$0xff] }
  0x56   : > { %v446_v13 = vmul.f32 %v1287_v9, %v385_v5  ;;  %v470_v14 = vmul.f32 %v1290_v10, %v409_v6  ;;  %v542_v18 = vmul.f32 %v1290_v10, %v385_v5  ;;  %v566_v19 = vmul.f32 %v1287_v9, %v409_v6  ;;  %v411_v24 = vld [vmem:[%s1264_s0 + $0x18] sm:$0xff]  ;;  %v1313_v28 = vld [vmem:[%s1273_s9 + $0x48] sm:$0xff]  ;;  %v1318_v31 = vld [vmem:[%s1264_s0 + $0x20] sm:$0xff] }
  0x57   : > { %v493_v20 = vsub.f32 %v445_v4, %v469_v8  ;;  %v447_v21 = vmul.f32 %v1298_v16, %v386_v11  ;;  %v471_v22 = vmul.f32 %v1301_v17, %v410_v15  ;;  %v1310_v25 = vld [vmem:[%s1273_s9 + $0x18] sm:$0xff]  ;;  %v589_v26 = vadd.f32 %v565_v7, %v541_v12  ;;  %v1327_v36 = vld [vmem:[%s1273_s9 + $0x20] sm:$0xff]  ;;  %v1330_v37 = vld [vmem:[%s1273_s9 + $0x50] sm:$0xff] }
  0x58   : > { %v494_v27 = vsub.f32 %v446_v13, %v470_v14  ;;  %v448_v29 = vmul.f32 %v1310_v25, %v387_v23  ;;  %v590_v32 = vadd.f32 %v566_v19, %v542_v18  ;;  %v543_v33 = vmul.f32 %v1301_v17, %v386_v11  ;;  %v1333_v38 = vld [vmem:[%s1256_s8 + $0x28] sm:$0xff]  ;;  %v1354_v45 = vld [vmem:[%s1273_s9 + $0x58] sm:$0xff]  ;;  %v1369_v51 = vld [vmem:[%s1256_s8 + $0x30] sm:$0xff] }
  0x59   : > { %517 = vst [vmem:[%s1322_s26] sm:$0xff] %v493_v20  ;;  %v495_v34 = vsub.f32 %v447_v21, %v471_v22  ;;  %v472_v35 = vmul.f32 %v1313_v28, %v411_v24  ;;  %613 = vst [vmem:[%s1336_s22] sm:$0xff] %v589_v26  ;;  %v567_v39 = vmul.f32 %v1298_v16, %v410_v15  ;;  %v1348_v43 = vld [vmem:[%s1264_s0 + $0x28] sm:$0xff]  ;;  %v1372_v52 = vld [vmem:[%s1264_s0 + $0x30] sm:$0xff] }
  0x5a   : > { %v1341_v40 = vmul.f32 %v1313_v28, %v387_v23  ;;  %518 = vst [vmem:[%s1322_s26 + $0x8] sm:$0xff] %v494_v27  ;;  %v449_v41 = vmul.f32 %v1327_v36, %v388_v30  ;;  %v473_v42 = vmul.f32 %v1330_v37, %v1318_v31  ;;  %v1351_v44 = vld [vmem:[%s1273_s9 + $0x28] sm:$0xff]  ;;  %614 = vst [vmem:[%s1336_s22 + $0x8] sm:$0xff] %v590_v32  ;;  %v1375_v53 = vld [vmem:[%s1256_s8 + $0x38] sm:$0xff] }
  0x5b   : > { %v1358_v46 = vmul.f32 %v1310_v25, %v411_v24  ;;  %v1361_v47 = vmul.f32 %v1330_v37, %v388_v30  ;;  %519 = vst [vmem:[%s1322_s26 + $0x10] sm:$0xff] %v495_v34  ;;  %v496_v48 = vsub.f32 %v448_v29, %v472_v35  ;;  %v450_v49 = vmul.f32 %v1351_v44, %v1333_v38  ;;  %v1382_v58 = vld [vmem:[%s1264_s0 + $0x38] sm:$0xff]  ;;  %v1387_v60 = vld [vmem:[%s1256_s8 + $0x40] sm:$0xff]  ;;  %v1400_v4 = vld [vmem:[%s1256_s8 + $0x48] sm:$0xff] }
  0x5c   : > { %v474_v50 = vmul.f32 %v1354_v45, %v1348_v43  ;;  %v591_v54 = vadd.f32 %v567_v39, %v543_v33  ;;  %v497_v55 = vsub.f32 %v449_v41, %v473_v42  ;;  %v451_v56 = vmul.f32 %v1276_v2, %v1369_v51  ;;  %v1390_v61 = vld [vmem:[%s1264_s0 + $0x40] sm:$0xff]  ;;  %v1403_v5 = vld [vmem:[%s1264_s0 + $0x48] sm:$0xff]  ;;  %v1406_v6 = vld [vmem:[%s1256_s8 + $0x50] sm:$0xff] }
  0x5d   : > { %v475_v57 = vmul.f32 %v1279_v3, %v1372_v52  ;;  %v452_v59 = vmul.f32 %v1287_v9, %v1375_v53  ;;  %520 = vst [vmem:[%s1322_s26 + $0x18] sm:$0xff] %v496_v48  ;;  %v476_v63 = vmul.f32 %v1290_v10, %v1382_v58  ;;  %v453_v0 = vmul.f32 %v1298_v16, %v1387_v60  ;;  %v1415_v12 = vld [vmem:[%s1264_s0 + $0x50] sm:$0xff]  ;;  %v1420_v14 = vld [vmem:[%s1256_s8 + $0x58] sm:$0xff]  ;;  %v1431_v22 = vld [vmem:[%s1256_s8 + $0x60] sm:$0xff] }
  0x5e   : > { %v498_v62 = vsub.f32 %v450_v49, %v474_v50  ;;  %v477_v1 = vmul.f32 %v1301_v17, %v1390_v61  ;;  %615 = vst [vmem:[%s1336_s22 + $0x10] sm:$0xff] %v591_v54  ;;  %521 = vst [vmem:[%s1322_s26 + $0x20] sm:$0xff] %v497_v55  ;;  %v454_v8 = vmul.f32 %v1310_v25, %v1400_v4  ;;  %v1423_v15 = vld [vmem:[%s1264_s0 + $0x58] sm:$0xff]  ;;  %v1434_v23 = vld [vmem:[%s1264_s0 + $0x60] sm:$0xff] }
  0x5f   : > { %v499_v7 = vsub.f32 %v451_v56, %v475_v57  ;;  %v478_v11 = vmul.f32 %v1313_v28, %v1403_v5  ;;  %v455_v13 = vmul.f32 %v1327_v36, %v1406_v6  ;;  %v500_v18 = vsub.f32 %v452_v59, %v476_v63  ;;  %v1437_v24 = vld [vmem:[%s1256_s8 + $0x68] sm:$0xff]  ;;  %v1450_v33 = vld [vmem:[%s1256_s8 + $0x70] sm:$0xff]  ;;  %v1464_v48 = vld [vmem:[%s1256_s8 + $0x78] sm:$0xff] }
  0x60   : > { %522 = vst [vmem:[%s1322_s26 + $0x28] sm:$0xff] %v498_v62  ;;  %v501_v19 = vsub.f32 %v453_v0, %v477_v1  ;;  %v479_v20 = vmul.f32 %v1330_v37, %v1415_v12  ;;  %v456_v21 = vmul.f32 %v1351_v44, %v1420_v14  ;;  %v480_v27 = vmul.f32 %v1354_v45, %v1423_v15  ;;  %v1447_v32 = vld [vmem:[%s1264_s0 + $0x68] sm:$0xff]  ;;  %v1453_v34 = vld [vmem:[%s1264_s0 + $0x70] sm:$0xff]  ;;  %v1467_v49 = vld [vmem:[%s1264_s0 + $0x78] sm:$0xff] }
  0x61   : > { %523 = vst [vmem:[%s1322_s26 + $0x30] sm:$0xff] %v499_v7  ;;  %v502_v26 = vsub.f32 %v454_v8, %v478_v11  ;;  %v457_v29 = vmul.f32 %v1276_v2, %v1431_v22  ;;  %v481_v30 = vmul.f32 %v1279_v3, %v1434_v23  ;;  %524 = vst [vmem:[%s1322_s26 + $0x38] sm:$0xff] %v500_v18  ;;  %v1470_v50 = vld [vmem:[%s1256_s8 + $0x80] sm:$0xff]  ;;  %v1481_v62 = vld [vmem:[%s1256_s8 + $0x88] sm:$0xff] }
  0x62   : > { %525 = vst [vmem:[%s1322_s26 + $0x40] sm:$0xff] %v501_v19  ;;  %v503_v35 = vsub.f32 %v455_v13, %v479_v20  ;;  %v458_v39 = vmul.f32 %v1287_v9, %v1437_v24  ;;  %v482_v41 = vmul.f32 %v1290_v10, %v1447_v32  ;;  %v459_v42 = vmul.f32 %v1298_v16, %v1450_v33  ;;  %v1478_v59 = vld [vmem:[%s1264_s0 + $0x80] sm:$0xff]  ;;  %v1484_v63 = vld [vmem:[%s1264_s0 + $0x88] sm:$0xff]  ;;  %v1494_v11 = vld [vmem:[%s1256_s8 + $0x90] sm:$0xff] }
  0x63   : > { %526 = vst [vmem:[%s1322_s26 + $0x48] sm:$0xff] %v502_v26  ;;  %v504_v54 = vsub.f32 %v456_v21, %v480_v27  ;;  %v505_v55 = vsub.f32 %v457_v29, %v481_v30  ;;  %v483_v56 = vmul.f32 %v1301_v17, %v1453_v34  ;;  %v460_v57 = vmul.f32 %v1310_v25, %v1464_v48  ;;  %v1497_v13 = vld [vmem:[%s1264_s0 + $0x90] sm:$0xff]  ;;  %v1500_v18 = vld [vmem:[%s1256_s8 + $0x98] sm:$0xff]  ;;  %v1514_v29 = vld [vmem:[%s1256_s8 + $0xa0] sm:$0xff] }
  0x64   : > { %527 = vst [vmem:[%s1322_s26 + $0x50] sm:$0xff] %v503_v35  ;;  %v506_v0 = vsub.f32 %v458_v39, %v482_v41  ;;  %v484_v1 = vmul.f32 %v1313_v28, %v1467_v49  ;;  %v461_v7 = vmul.f32 %v1327_v36, %v1470_v50  ;;  %v485_v8 = vmul.f32 %v1330_v37, %v1478_v59  ;;  %v1511_v27 = vld [vmem:[%s1264_s0 + $0x98] sm:$0xff]  ;;  %v1517_v30 = vld [vmem:[%s1264_s0 + $0xa0] sm:$0xff] }
  0x65   : > { %1747 = vst [vmem:[#allocation28_spill] sm:$0xff] %v1494_v11  ;;  %1748 = vst [vmem:[#allocation29_spill] sm:$0xff] %v1500_v18  ;;  %v507_v19 = vsub.f32 %v459_v42, %v483_v56  ;;  %v462_v20 = vmul.f32 %v1351_v44, %v1481_v62  ;;  %v486_v21 = vmul.f32 %v1354_v45, %v1484_v63  ;;  %v1531_v56 = vld [vmem:[%s1256_s8 + $0xb0] sm:$0xff] }
  0x66   : > { %528 = vst [vmem:[%s1322_s26 + $0x58] sm:$0xff] %v504_v54  ;;  %529 = vst [vmem:[%s1322_s26 + $0x60] sm:$0xff] %v505_v55  ;;  %v463_v26 = vmul.f32 %v1276_v2, %v1494_v11  ;;  %v508_v35 = vsub.f32 %v460_v57, %v484_v1  ;;  %v509_v39 = vsub.f32 %v461_v7, %v485_v8  ;;  %v1525_v54 = vld [vmem:[%s1256_s8 + $0xa8] sm:$0xff]  ;;  %v1541_v7 = vld [vmem:[%s1264_s0 + $0xb0] sm:$0xff] }
  0x67   : > { %1749 = vst [vmem:[#allocation30_spill] sm:$0xff] %v1511_v27  ;;  %1750 = vst [vmem:[#allocation31_spill] sm:$0xff] %v1514_v29  ;;  %v487_v41 = vmul.f32 %v1279_v3, %v1497_v13  ;;  %v464_v42 = vmul.f32 %v1287_v9, %v1500_v18  ;;  %v1528_v55 = vld [vmem:[%s1264_s0 + $0xa8] sm:$0xff]  ;;  %v510_v11 = vsub.f32 %v462_v20, %v486_v21  ;;  %v1544_v8 = vld [vmem:[%s1256_s8 + $0xb8] sm:$0xff] }
  0x68   : > { %1751 = vst [vmem:[#allocation32_spill] sm:$0xff] %v1517_v30  ;;  %530 = vst [vmem:[%s1322_s26 + $0x68] sm:$0xff] %v506_v0  ;;  %v488_v57 = vmul.f32 %v1290_v10, %v1511_v27  ;;  %v465_v0 = vmul.f32 %v1298_v16, %v1514_v29  ;;  %v489_v1 = vmul.f32 %v1301_v17, %v1517_v30  ;;  %v1547_v18 = vld [vmem:[%s1264_s0 + $0xb8] sm:$0xff] }
  0x69   : > { %1752 = vst [vmem:[#allocation33_spill] sm:$0xff] %v1531_v56  ;;  %531 = vst [vmem:[%s1322_s26 + $0x70] sm:$0xff] %v507_v19  ;;  %v511_v19 = vsub.f32 %v463_v26, %v487_v41  ;;  %v466_v20 = vmul.f32 %v1310_v25, %v1525_v54  ;;  %v490_v21 = vmul.f32 %v1313_v28, %v1528_v55 }
  0x6a   : > { %532 = vst [vmem:[%s1322_s26 + $0x78] sm:$0xff] %v508_v35  ;;  %533 = vst [vmem:[%s1322_s26 + $0x80] sm:$0xff] %v509_v39  ;;  %v467_v30 = vmul.f32 %v1327_v36, %v1531_v56  ;;  %v512_v29 = vsub.f32 %v464_v42, %v488_v57  ;;  %v513_v27 = vsub.f32 %v465_v0, %v489_v1 }
  0x6b   : > { %534 = vst [vmem:[%s1322_s26 + $0x88] sm:$0xff] %v510_v11  ;;  %v491_v35 = vmul.f32 %v1330_v37, %v1541_v7  ;;  %v468_v26 = vmul.f32 %v1351_v44, %v1544_v8  ;;  %535 = vst [vmem:[%s1322_s26 + $0x90] sm:$0xff] %v511_v19  ;;  %v514_v39 = vsub.f32 %v466_v20, %v490_v21 }
  0x6c   : > { %v492_v41 = vmul.f32 %v1354_v45, %v1547_v18  ;;  %v592_v56 = vadd.f32 %v1358_v46, %v1341_v40  ;;  %v569_v11 = vmul.f32 %v1327_v36, %v1318_v31  ;;  %536 = vst [vmem:[%s1322_s26 + $0x98] sm:$0xff] %v512_v29  ;;  %537 = vst [vmem:[%s1322_s26 + $0xa0] sm:$0xff] %v513_v27 }
  0x6d   : > { %v515_v42 = vsub.f32 %v467_v30, %v491_v35  ;;  %v546_v57 = vmul.f32 %v1354_v45, %v1333_v38  ;;  %v570_v0 = vmul.f32 %v1351_v44, %v1348_v43  ;;  %v547_v1 = vmul.f32 %v1279_v3, %v1369_v51  ;;  %538 = vst [vmem:[%s1322_s26 + $0xa8] sm:$0xff] %v514_v39 }
  0x6e   : > { %v516_v19 = vsub.f32 %v468_v26, %v492_v41  ;;  %616 = vst [vmem:[%s1336_s22 + $0x18] sm:$0xff] %v592_v56  ;;  %v593_v31 = vadd.f32 %v569_v11, %v1361_v47  ;;  %v571_v40 = vmul.f32 %v1276_v2, %v1372_v52  ;;  %v548_v46 = vmul.f32 %v1290_v10, %v1375_v53  ;;  %v1753_v41 = vld [vmem:[#allocation28_spill] sm:$0xff] }
  0x6f   : > { %539 = vst [vmem:[%s1322_s26 + $0xb0] sm:$0xff] %v515_v42  ;;  %v594_v38 = vadd.f32 %v570_v0, %v546_v57  ;;  %v572_v43 = vmul.f32 %v1287_v9, %v1382_v58  ;;  %v549_v51 = vmul.f32 %v1301_v17, %v1387_v60  ;;  %v573_v27 = vmul.f32 %v1298_v16, %v1390_v61  ;;  %v1754_v42 = vld [vmem:[#allocation29_spill] sm:$0xff] }
  0x70   : > { %540 = vst [vmem:[%s1322_s26 + $0xb8] sm:$0xff] %v516_v19  ;;  %617 = vst [vmem:[%s1336_s22 + $0x20] sm:$0xff] %v593_v31  ;;  %v595_v47 = vadd.f32 %v571_v40, %v547_v1  ;;  %v550_v52 = vmul.f32 %v1313_v28, %v1400_v4  ;;  %v574_v53 = vmul.f32 %v1310_v25, %v1403_v5 }
  0x71   : > { %v551_v58 = vmul.f32 %v1330_v37, %v1406_v6  ;;  %618 = vst [vmem:[%s1336_s22 + $0x28] sm:$0xff] %v594_v38  ;;  %v596_v60 = vadd.f32 %v572_v43, %v548_v46  ;;  %v597_v29 = vadd.f32 %v573_v27, %v549_v51  ;;  %v575_v61 = vmul.f32 %v1327_v36, %v1415_v12 }
  0x72   : > { %v552_v30 = vmul.f32 %v1354_v45, %v1420_v14  ;;  %619 = vst [vmem:[%s1336_s22 + $0x30] sm:$0xff] %v595_v47  ;;  %v598_v56 = vadd.f32 %v574_v53, %v550_v52  ;;  %v576_v4 = vmul.f32 %v1351_v44, %v1423_v15  ;;  %v553_v5 = vmul.f32 %v1279_v3, %v1431_v22 }
  0x73   : > { %v577_v6 = vmul.f32 %v1276_v2, %v1434_v23  ;;  %620 = vst [vmem:[%s1336_s22 + $0x38] sm:$0xff] %v596_v60  ;;  %621 = vst [vmem:[%s1336_s22 + $0x40] sm:$0xff] %v597_v29  ;;  %v599_v12 = vadd.f32 %v575_v61, %v551_v58  ;;  %v554_v14 = vmul.f32 %v1290_v10, %v1437_v24 }
  0x74   : > { %v578_v20 = vmul.f32 %v1287_v9, %v1447_v32  ;;  %v555_v15 = vmul.f32 %v1301_v17, %v1450_v33  ;;  %622 = vst [vmem:[%s1336_s22 + $0x48] sm:$0xff] %v598_v56  ;;  %v600_v22 = vadd.f32 %v576_v4, %v552_v30  ;;  %v579_v23 = vmul.f32 %v1298_v16, %v1453_v34 }
  0x75   : > { %v601_v21 = vadd.f32 %v577_v6, %v553_v5  ;;  %v556_v35 = vmul.f32 %v1313_v28, %v1464_v48  ;;  %623 = vst [vmem:[%s1336_s22 + $0x50] sm:$0xff] %v599_v12  ;;  %v580_v24 = vmul.f32 %v1310_v25, %v1467_v49  ;;  %v557_v32 = vmul.f32 %v1330_v37, %v1470_v50 }
  0x76   : > { %v602_v26 = vadd.f32 %v578_v20, %v554_v14  ;;  %v581_v33 = vmul.f32 %v1327_v36, %v1478_v59  ;;  %624 = vst [vmem:[%s1336_s22 + $0x58] sm:$0xff] %v600_v22  ;;  %v603_v34 = vadd.f32 %v579_v23, %v555_v15  ;;  %v558_v48 = vmul.f32 %v1354_v45, %v1481_v62  ;;  %v1755_v62 = vld [vmem:[#allocation30_spill] sm:$0xff] }
  0x77   : > { %625 = vst [vmem:[%s1336_s22 + $0x60] sm:$0xff] %v601_v21  ;;  %v582_v39 = vmul.f32 %v1351_v44, %v1484_v63  ;;  %v559_v49 = vmul.f32 %v1279_v3, %v1753_v41  ;;  %v604_v50 = vadd.f32 %v580_v24, %v556_v35  ;;  %v583_v59 = vmul.f32 %v1276_v2, %v1497_v13  ;;  %v1756_v63 = vld [vmem:[#allocation31_spill] sm:$0xff]  ;;  %v1757_v3 = vld [vmem:[#allocation32_spill] sm:$0xff] }
  0x78   : > { %626 = vst [vmem:[%s1336_s22 + $0x68] sm:$0xff] %v602_v26  ;;  %v605_v11 = vadd.f32 %v581_v33, %v557_v32  ;;  %v560_v57 = vmul.f32 %v1290_v10, %v1754_v42  ;;  %627 = vst [vmem:[%s1336_s22 + $0x70] sm:$0xff] %v603_v34  ;;  %v584_v1 = vmul.f32 %v1287_v9, %v1755_v62  ;;  %v1758_v9 = vld [vmem:[#allocation33_spill] sm:$0xff] }
  0x79   : > { %v606_v0 = vadd.f32 %v582_v39, %v558_v48  ;;  %v561_v19 = vmul.f32 %v1301_v17, %v1756_v63  ;;  %v585_v31 = vmul.f32 %v1298_v16, %v1757_v3  ;;  %628 = vst [vmem:[%s1336_s22 + $0x78] sm:$0xff] %v604_v50  ;;  %v607_v2 = vadd.f32 %v583_v59, %v559_v49 }
  0x7a   : > { %629 = vst [vmem:[%s1336_s22 + $0x80] sm:$0xff] %v605_v11  ;;  %v562_v10 = vmul.f32 %v1313_v28, %v1525_v54  ;;  %v586_v13 = vmul.f32 %v1310_v25, %v1528_v55  ;;  %v563_v17 = vmul.f32 %v1330_v37, %v1758_v9  ;;  %v608_v16 = vadd.f32 %v584_v1, %v560_v57 }
  0x7b   : > { %630 = vst [vmem:[%s1336_s22 + $0x88] sm:$0xff] %v606_v0  ;;  %v609_v40 = vadd.f32 %v585_v31, %v561_v19  ;;  %v587_v46 = vmul.f32 %v1327_v36, %v1541_v7  ;;  %v564_v38 = vmul.f32 %v1354_v45, %v1544_v8  ;;  %631 = vst [vmem:[%s1336_s22 + $0x90] sm:$0xff] %v607_v2 }
  0x7c   : > { %v610_v28 = vadd.f32 %v586_v13, %v562_v10  ;;  %v588_v25 = vmul.f32 %v1351_v44, %v1547_v18  ;;  %632 = vst [vmem:[%s1336_s22 + $0x98] sm:$0xff] %v608_v16 }
  0x7d   : > { %633 = vst [vmem:[%s1336_s22 + $0xa0] sm:$0xff] %v609_v40  ;;  %v611_v54 = vadd.f32 %v587_v46, %v563_v17 }
  0x7e   : > { %634 = vst [vmem:[%s1336_s22 + $0xa8] sm:$0xff] %v610_v28  ;;  %v612_v37 = vadd.f32 %v588_v25, %v564_v38 }
  0x7f   : > { %635 = vst [vmem:[%s1336_s22 + $0xb0] sm:$0xff] %v611_v54 }
  0x80   : > { %636 = vst [vmem:[%s1336_s22 + $0xb8] sm:$0xff] %v612_v37 }
  0x81   : > { %s892_s5 = smul.u32 768, %s1140_s19  ;;  %s666_s30 = sshll.u32 %s1322_s26, 4  ;;  %s667_s30 = int_to_ptr.vmem [resolvable:$true] %s666_s30 }
  0x82   : > { %s1080_s13 = smov 768   ;;  %s1081_s7 = smov 3072  }
  0x83   : > { %s655_s23 = scalar_lea.hbm %s1733_s3, %s892_s5  ;;  %926 = sst [smem:[#allocation18]] (%p1167_p9), %s1080_s13 }
  0x84   : > { %927 = sst [smem:[#allocation18 + $0x1]] (%p1167_p9), %s1081_s7  ;;  %s1082_s8 = smov 6  }
  0x85   : > { %928 = sst [smem:[#allocation18 + $0x2]] (%p1167_p9), %s1082_s8  ;;  %s1083_s25 = smov 128  }
  0x86   : > { %929 = sst [smem:[#allocation18 + $0x3]] (%p1167_p9), %s1083_s25  ;;  %s1084_s19 = smov 8  }
  0x87   : > { %930 = sst [smem:[#allocation18 + $0x4]] (%p1167_p9), %s1083_s25  ;;  %s1085_s20 = smov 131072  }
  0x88   : > { %931 = sst [smem:[#allocation18 + $0x5]] (%p1167_p9), %s1084_s19  ;;  %s1086_s0 = smov 0  }
  0x89   : > { %932 = dma.general (%p1167_p9), %s667_s30, 3072, %s655_s23, %s638_s6, %s1085_s20, [#allocation18], %s1086_s0, 0  }
  0x8a   : > { %s694_s26 = scalar_lea.hbm %s1734_s4, %s892_s5  ;;  %s705_s14 = sshll.u32 %s1336_s22, 4  ;;  %s706_s14 = int_to_ptr.vmem [resolvable:$true] %s705_s14 }
  0x8b   : > { %s1087_s11 = smov 768   ;;  %s1088_s13 = smov 3072  }
  0x8c   : > { %933 = sst [smem:[#allocation20]] (%p1167_p9), %s1087_s11  ;;  %s1089_s6 = smov 6  }
  0x8d   : > { %934 = sst [smem:[#allocation20 + $0x1]] (%p1167_p9), %s1088_s13  ;;  %s1090_s30 = smov 128  }
  0x8e   : > { %935 = sst [smem:[#allocation20 + $0x2]] (%p1167_p9), %s1089_s6  ;;  %s1091_s23 = smov 8  }
  0x8f   : > { %936 = sst [smem:[#allocation20 + $0x3]] (%p1167_p9), %s1090_s30  ;;  %s1092_s5 = smov 131072  }
  0x90   : > { %937 = sst [smem:[#allocation20 + $0x4]] (%p1167_p9), %s1090_s30  ;;  %s1093_s22 = smov 0  }
  0x91   : > { %938 = sst [smem:[#allocation20 + $0x5]] (%p1167_p9), %s1091_s23 }
  0x92   : > { %939 = dma.general (%p1167_p9), %s706_s14, 3072, %s694_s26, %s643_s29, %s1092_s5, [#allocation20], %s1093_s22, 0  }
  0x93 PF: > { %p949_p1 = scmp.ge.s32.totalorder %s1060_s18, 2  ;;  %s733_s7 = sand.u32 1, %s1048_s15  }
  0x94   : > { %s734_s8 = scalar_lea.sflag [#allocation4], %s733_s7 }
  0x95   : > { %p943_p2 = pnand %p949_p1, %p1171_p10 }
  0x97   : > { %p944_p3 = pneg %p943_p2 }
  0x99   : > { %1039 = dma.done.wait (%p944_p3), %s734_s8, 3072  }
  0x9a   : > { %1041 = vsyncadd (%p944_p3), %s734_s8, 4294964224  ;;  %s743_s25 = scalar_lea.sflag [#allocation10], %s733_s7 }
  0x9b   : > { %1043 = dma.done.wait (%p944_p3), %s743_s25, 3072  }
  0x9c   : > { %1045 = vsyncadd (%p944_p3), %s743_s25, 4294964224  ;;  %p24_p4 = scmp.ge.s32.totalorder %s1144_s21, 6   ;;  %s1759_s15 = smov %s1052_s16 }
  0x9d   : > { %s1760_s16 = smov %s1056_s17  ;;  %s1761_s17 = smov %s1156_s24 }
  0x9e   : > { %s1762_s18 = smov %s1144_s21  ;;  %26 = sbr.rel (!%p24_p4) target bundleno = 11 (0xb), region = 144 }
  0xa3   :  { %748 = vsyncpa [#allocation3], 1 }
  0xa4   :  { %750 = vsyncpa [#allocation3 + $0x1], 1 }
  0xa5   :  { %751 = vsyncpa [#allocation6], 1 }
  0xa6   :  { %753 = vsyncpa [#allocation6 + $0x1], 1 }
  0xa7   :  { %754 = vsyncpa [#allocation4], 1 }
  0xa8   :  { %756 = vsyncpa [#allocation4 + $0x1], 1 }
  0xa9   :  { %757 = vsyncpa [#allocation10], 1 }
  0xaa   :  { %759 = vsyncpa [#allocation10 + $0x1], 1 }

</bundles_post_ra>
